<compile_context>
chip_gen: v7x
topology: tpu7x:2x2x1
jax: 0.10.0
libtpu: 0.0.40
codegen_flags: <defaults>
</compile_context>

<pallas_src>
import jax
import jax.numpy as jnp
from jax.experimental import pallas as pl
from jax.experimental.pallas import tpu as pltpu

HIDDEN = 200                       # logical hidden size of the PyTorch module
H_PAD = 256                        # padded hidden size (multiple of 128 lanes)
IN_FEATURES = 6
OUT_FEATURES = 107 - 3 - 2 - 50    # 52
OUT_PAD = 128                      # lane-dense padded output width


# ----------------------------------------------------------------------------
# Kernel
# ----------------------------------------------------------------------------
def lstm_service_kernel(x_ref, w1_ref, b1_ref, w2_ref, b2_ref,
                        wl_ref, bl_ref, out_ref):
    Hp = H_PAD

    def cell(h, w_ref, b_ref):
        # gates layout: [i | g | o], each block H_PAD wide (f gate dropped).
        # Cast activations to the weight dtype (bf16 for the big weights) so
        # the MXU sees a homogeneous-dtype matmul; accumulate in f32.
        gates = jnp.dot(h.astype(w_ref.dtype), w_ref[...],
                        preferred_element_type=jnp.float32) + b_ref[...]
        i = jax.nn.sigmoid(gates[:, 0 * Hp:1 * Hp])   # 128-lane aligned slices
        g = jnp.tanh(gates[:, 1 * Hp:2 * Hp])
        o = jax.nn.sigmoid(gates[:, 2 * Hp:3 * Hp])
        return o * jnp.tanh(i * g)                    # c_new = i * g (c0 == 0)

    x = x_ref[...]                                    # (B, 6) f32
    h1 = cell(x, w1_ref, b1_ref)                      # (B, H_PAD)
    h2 = cell(h1, w2_ref, b2_ref)                     # (B, H_PAD)
    h3 = cell(h2, w2_ref, b2_ref)                     # lstm2 reused (as in ref)

    out_ref[...] = (jnp.dot(h3.astype(wl_ref.dtype), wl_ref[...],
                            preferred_element_type=jnp.float32)
                    + bl_ref[...])                    # (B, OUT_PAD)


# ----------------------------------------------------------------------------
# Wrapper
# ----------------------------------------------------------------------------
def lstm_service_forward(y, kparams):
    """y: (n_samples, batch, 6) float32. Returns (batch, OUT_FEATURES)."""
    if y.ndim != 3:
        y = jnp.expand_dims(y, axis=0)
    x = y[0].astype(jnp.float32)                      # (B, 6)
    B = x.shape[0]

    w1, b1, w2, b2, wl, bl = kparams

    out_padded = pl.pallas_call(
        lstm_service_kernel,
        out_shape=jax.ShapeDtypeStruct((B, OUT_PAD), jnp.float32),
        in_specs=[pl.BlockSpec(memory_space=pltpu.MemorySpace.VMEM)] * 7,
        out_specs=pl.BlockSpec(memory_space=pltpu.MemorySpace.VMEM),
    )(x, w1, b1, w2, b2, wl, bl)
    return out_padded[:, :OUT_FEATURES]


# ----------------------------------------------------------------------------
# Parameters
# ----------------------------------------------------------------------------
def init_raw_params(key):
    """PyTorch-shaped f32 parameters (gate order i, f, g, o)."""
    H = HIDDEN
    k = jax.random.split(key, 8)
    bound = 1.0 / jnp.sqrt(H)

    w_ih1 = jax.random.uniform(k[0], (4 * H, IN_FEATURES), jnp.float32, -bound, bound)
    b_ih1 = jax.random.uniform(k[1], (4 * H,), jnp.float32, -bound, bound)
    b_hh1 = jax.random.uniform(k[2], (4 * H,), jnp.float32, -bound, bound)

    w_ih2 = jax.random.uniform(k[3], (4 * H, H), jnp.float32, -bound, bound)
    b_ih2 = jax.random.uniform(k[4], (4 * H,), jnp.float32, -bound, bound)
    b_hh2 = jax.random.uniform(k[5], (4 * H,), jnp.float32, -bound, bound)

    w_lin = jax.random.uniform(k[6], (OUT_FEATURES, H), jnp.float32, -bound, bound)
    b_lin = jax.random.uniform(k[7], (OUT_FEATURES,), jnp.float32, -bound, bound)

    # TODO(synk): weight_hh_* and the lstm3 parameters exist in the PyTorch
    # module but never affect forward() (h0 == 0 / lstm3 unused), so only the
    # b_hh biases are materialized here.
    return dict(w_ih1=w_ih1, b_ih1=b_ih1, b_hh1=b_hh1,
                w_ih2=w_ih2, b_ih2=b_ih2, b_hh2=b_hh2,
                w_lin=w_lin, b_lin=b_lin)


def pack_kernel_params(raw):
    """Drop dead f-gate, transpose, pad to 128-lane boundaries, cast big
    weights to bf16."""
    H, Hp = HIDDEN, H_PAD

    def pack_cell(w_ih, b_fused, in_pad, weight_dtype):
        in_dim = w_ih.shape[1]
        w_cols, b_cols = [], []
        for gate in (0, 2, 3):                              # i, g, o (skip f)
            wg = w_ih[gate * H:(gate + 1) * H, :].T         # (in, H)
            wg = jnp.pad(wg, ((0, in_pad - in_dim), (0, Hp - H)))
            w_cols.append(wg)
            b_cols.append(jnp.pad(b_fused[gate * H:(gate + 1) * H], (0, Hp - H)))
        w = jnp.concatenate(w_cols, axis=1).astype(weight_dtype)   # (in_pad, 3*Hp)
        b = jnp.concatenate(b_cols).reshape(1, 3 * Hp).astype(jnp.float32)
        return w, b

    # lstm1: tiny weight (6 x 768) -> keep f32 (no DMA win, exact layer-1 math).
    w1, b1 = pack_cell(raw['w_ih1'], raw['b_ih1'] + raw['b_hh1'],
                       IN_FEATURES, jnp.float32)
    # lstm2: dominant weight -> bf16, rows padded to H_PAD.
    w2, b2 = pack_cell(raw['w_ih2'], raw['b_ih2'] + raw['b_hh2'],
                       H_PAD, jnp.bfloat16)

    # linear head: (H, 52) -> padded (H_PAD, OUT_PAD) bf16, lane-dense output.
    wl = jnp.pad(raw['w_lin'].T,
                 ((0, Hp - H), (0, OUT_PAD - OUT_FEATURES))).astype(jnp.bfloat16)
    bl = jnp.pad(raw['b_lin'],
                 (0, OUT_PAD - OUT_FEATURES)).reshape(1, OUT_PAD).astype(jnp.float32)

    return (w1, b1, w2, b2, wl, bl)


# ----------------------------------------------------------------------------
# Pure-JAX f32 reference (faithful to the PyTorch module)
# ----------------------------------------------------------------------------
def reference_forward(y, raw):
    if y.ndim != 3:
        y = jnp.expand_dims(y, axis=0)
    x = y[0].astype(jnp.float32)
    H = HIDDEN

    def cell(h_in, w_ih, b_ih, b_hh):
        gates = h_in @ w_ih.T + b_ih + b_hh          # W_hh @ h0 == 0
        i = jax.nn.sigmoid(gates[:, 0 * H:1 * H])
        g = jnp.tanh(gates[:, 2 * H:3 * H])
        o = jax.nn.sigmoid(gates[:, 3 * H:4 * H])
        c = i * g                                    # f * c0 == 0
        return o * jnp.tanh(c)

    h1 = cell(x, raw['w_ih1'], raw['b_ih1'], raw['b_hh1'])
    h2 = cell(h1, raw['w_ih2'], raw['b_ih2'], raw['b_hh2'])
    h3 = cell(h2, raw['w_ih2'], raw['b_ih2'], raw['b_hh2'])
    return h3 @ raw['w_lin'].T + raw['b_lin']


if __name__ == "__main__":
    key = jax.random.PRNGKey(0)
    pkey, dkey = jax.random.split(key)

    raw_params = init_raw_params(pkey)
    kernel_params = pack_kernel_params(raw_params)

    # y: (n_samples=3, batch=2, features=6); only y[0] is consumed by forward.
    y = jax.random.normal(dkey, (3, 2, IN_FEATURES), dtype=jnp.float32)

    out = lstm_service_forward(y, kernel_params)
    out = jax.block_until_ready(out)

    ref = reference_forward(y, raw_params)
    assert out.shape == (2, OUT_FEATURES), out.shape
    # Big weights are bf16 on the MXU (f32 accumulate); compare against the
    # full-f32 reference with a correspondingly relaxed tolerance.
    assert jnp.allclose(out, ref, atol=2e-2, rtol=2e-2), \
        float(jnp.max(jnp.abs(out - ref)))

    print("KERNEL_OK")
</pallas_src>

<mosaic_0001>
module attributes {stable_mosaic.version = 11 : i64} {
  func.func @lstm_service_kernel(%arg0: memref<2x6xf32, #tpu.memory_space<vmem>>, %arg1: memref<6x768xf32, #tpu.memory_space<vmem>>, %arg2: memref<1x768xf32, #tpu.memory_space<vmem>>, %arg3: memref<256x768xbf16, #tpu.memory_space<vmem>>, %arg4: memref<1x768xf32, #tpu.memory_space<vmem>>, %arg5: memref<256x128xbf16, #tpu.memory_space<vmem>>, %arg6: memref<1x128xf32, #tpu.memory_space<vmem>>, %arg7: memref<2x128xf32, #tpu.memory_space<vmem>>) attributes {dimension_semantics = [], scalar_prefetch = 0 : i64, scratch_operands = 0 : i64, tpu.core_type = #tpu.core_type<tc>} {
    %c0 = arith.constant 0 : index
    %c0_0 = arith.constant 0 : index
    %0 = vector.load %arg0[%c0, %c0_0] : memref<2x6xf32, #tpu.memory_space<vmem>>, vector<2x6xf32>
    %c0_1 = arith.constant 0 : index
    %c0_2 = arith.constant 0 : index
    %1 = vector.load %arg1[%c0_1, %c0_2] : memref<6x768xf32, #tpu.memory_space<vmem>>, vector<6x768xf32>
    %cst = arith.constant dense<0.000000e+00> : vector<2x768xf32>
    %2 = tpu.matmul %0, %1, %cst {dimension_numbers = #tpu.dot_dimension_numbers<[1], [0], [0], [1], [0, 0, 1, 1], [], []>} : vector<2x6xf32>, vector<6x768xf32>, vector<2x768xf32> -> vector<2x768xf32>
    %c0_3 = arith.constant 0 : index
    %c0_4 = arith.constant 0 : index
    %3 = vector.load %arg2[%c0_3, %c0_4] : memref<1x768xf32, #tpu.memory_space<vmem>>, vector<1x768xf32>
    %4 = vector.broadcast %3 : vector<1x768xf32> to vector<2x768xf32>
    %5 = arith.addf %2, %4 : vector<2x768xf32>
    %6 = vector.extract_strided_slice %5 {offsets = [0, 0], sizes = [2, 256], strides = [1, 1]} : vector<2x768xf32> to vector<2x256xf32>
    %7 = arith.negf %6 : vector<2x256xf32>
    %8 = math.exp %7 : vector<2x256xf32>
    %cst_5 = arith.constant 1.000000e+00 : f32
    %9 = vector.broadcast %cst_5 : f32 to vector<2x256xf32>
    %10 = arith.addf %9, %8 : vector<2x256xf32>
    %11 = arith.divf %9, %10 : vector<2x256xf32>
    %12 = vector.extract_strided_slice %5 {offsets = [0, 256], sizes = [2, 256], strides = [1, 1]} : vector<2x768xf32> to vector<2x256xf32>
    %13 = math.tanh %12 : vector<2x256xf32>
    %14 = vector.extract_strided_slice %5 {offsets = [0, 512], sizes = [2, 256], strides = [1, 1]} : vector<2x768xf32> to vector<2x256xf32>
    %15 = arith.negf %14 : vector<2x256xf32>
    %16 = math.exp %15 : vector<2x256xf32>
    %cst_6 = arith.constant 1.000000e+00 : f32
    %17 = vector.broadcast %cst_6 : f32 to vector<2x256xf32>
    %18 = arith.addf %17, %16 : vector<2x256xf32>
    %19 = arith.divf %17, %18 : vector<2x256xf32>
    %20 = arith.mulf %11, %13 : vector<2x256xf32>
    %21 = math.tanh %20 : vector<2x256xf32>
    %22 = arith.mulf %19, %21 : vector<2x256xf32>
    %23 = arith.truncf %22 : vector<2x256xf32> to vector<2x256xbf16>
    %c0_7 = arith.constant 0 : index
    %c0_8 = arith.constant 0 : index
    %24 = vector.load %arg3[%c0_7, %c0_8] : memref<256x768xbf16, #tpu.memory_space<vmem>>, vector<256x768xbf16>
    %cst_9 = arith.constant dense<0.000000e+00> : vector<2x768xf32>
    %25 = tpu.matmul %23, %24, %cst_9 {dimension_numbers = #tpu.dot_dimension_numbers<[1], [0], [0], [1], [0, 0, 1, 1], [], []>} : vector<2x256xbf16>, vector<256x768xbf16>, vector<2x768xf32> -> vector<2x768xf32>
    %c0_10 = arith.constant 0 : index
    %c0_11 = arith.constant 0 : index
    %26 = vector.load %arg4[%c0_10, %c0_11] : memref<1x768xf32, #tpu.memory_space<vmem>>, vector<1x768xf32>
    %27 = vector.broadcast %26 : vector<1x768xf32> to vector<2x768xf32>
    %28 = arith.addf %25, %27 : vector<2x768xf32>
    %29 = vector.extract_strided_slice %28 {offsets = [0, 0], sizes = [2, 256], strides = [1, 1]} : vector<2x768xf32> to vector<2x256xf32>
    %30 = arith.negf %29 : vector<2x256xf32>
    %31 = math.exp %30 : vector<2x256xf32>
    %cst_12 = arith.constant 1.000000e+00 : f32
    %32 = vector.broadcast %cst_12 : f32 to vector<2x256xf32>
    %33 = arith.addf %32, %31 : vector<2x256xf32>
    %34 = arith.divf %32, %33 : vector<2x256xf32>
    %35 = vector.extract_strided_slice %28 {offsets = [0, 256], sizes = [2, 256], strides = [1, 1]} : vector<2x768xf32> to vector<2x256xf32>
    %36 = math.tanh %35 : vector<2x256xf32>
    %37 = vector.extract_strided_slice %28 {offsets = [0, 512], sizes = [2, 256], strides = [1, 1]} : vector<2x768xf32> to vector<2x256xf32>
    %38 = arith.negf %37 : vector<2x256xf32>
    %39 = math.exp %38 : vector<2x256xf32>
    %cst_13 = arith.constant 1.000000e+00 : f32
    %40 = vector.broadcast %cst_13 : f32 to vector<2x256xf32>
    %41 = arith.addf %40, %39 : vector<2x256xf32>
    %42 = arith.divf %40, %41 : vector<2x256xf32>
    %43 = arith.mulf %34, %36 : vector<2x256xf32>
    %44 = math.tanh %43 : vector<2x256xf32>
    %45 = arith.mulf %42, %44 : vector<2x256xf32>
    %46 = arith.truncf %45 : vector<2x256xf32> to vector<2x256xbf16>
    %c0_14 = arith.constant 0 : index
    %c0_15 = arith.constant 0 : index
    %47 = vector.load %arg3[%c0_14, %c0_15] : memref<256x768xbf16, #tpu.memory_space<vmem>>, vector<256x768xbf16>
    %cst_16 = arith.constant dense<0.000000e+00> : vector<2x768xf32>
    %48 = tpu.matmul %46, %47, %cst_16 {dimension_numbers = #tpu.dot_dimension_numbers<[1], [0], [0], [1], [0, 0, 1, 1], [], []>} : vector<2x256xbf16>, vector<256x768xbf16>, vector<2x768xf32> -> vector<2x768xf32>
    %c0_17 = arith.constant 0 : index
    %c0_18 = arith.constant 0 : index
    %49 = vector.load %arg4[%c0_17, %c0_18] : memref<1x768xf32, #tpu.memory_space<vmem>>, vector<1x768xf32>
    %50 = vector.broadcast %49 : vector<1x768xf32> to vector<2x768xf32>
    %51 = arith.addf %48, %50 : vector<2x768xf32>
    %52 = vector.extract_strided_slice %51 {offsets = [0, 0], sizes = [2, 256], strides = [1, 1]} : vector<2x768xf32> to vector<2x256xf32>
    %53 = arith.negf %52 : vector<2x256xf32>
    %54 = math.exp %53 : vector<2x256xf32>
    %cst_19 = arith.constant 1.000000e+00 : f32
    %55 = vector.broadcast %cst_19 : f32 to vector<2x256xf32>
    %56 = arith.addf %55, %54 : vector<2x256xf32>
    %57 = arith.divf %55, %56 : vector<2x256xf32>
    %58 = vector.extract_strided_slice %51 {offsets = [0, 256], sizes = [2, 256], strides = [1, 1]} : vector<2x768xf32> to vector<2x256xf32>
    %59 = math.tanh %58 : vector<2x256xf32>
    %60 = vector.extract_strided_slice %51 {offsets = [0, 512], sizes = [2, 256], strides = [1, 1]} : vector<2x768xf32> to vector<2x256xf32>
    %61 = arith.negf %60 : vector<2x256xf32>
    %62 = math.exp %61 : vector<2x256xf32>
    %cst_20 = arith.constant 1.000000e+00 : f32
    %63 = vector.broadcast %cst_20 : f32 to vector<2x256xf32>
    %64 = arith.addf %63, %62 : vector<2x256xf32>
    %65 = arith.divf %63, %64 : vector<2x256xf32>
    %66 = arith.mulf %57, %59 : vector<2x256xf32>
    %67 = math.tanh %66 : vector<2x256xf32>
    %68 = arith.mulf %65, %67 : vector<2x256xf32>
    %69 = arith.truncf %68 : vector<2x256xf32> to vector<2x256xbf16>
    %c0_21 = arith.constant 0 : index
    %c0_22 = arith.constant 0 : index
    %70 = vector.load %arg5[%c0_21, %c0_22] : memref<256x128xbf16, #tpu.memory_space<vmem>>, vector<256x128xbf16>
    %cst_23 = arith.constant dense<0.000000e+00> : vector<2x128xf32>
    %71 = tpu.matmul %69, %70, %cst_23 {dimension_numbers = #tpu.dot_dimension_numbers<[1], [0], [0], [1], [0, 0, 1, 1], [], []>} : vector<2x256xbf16>, vector<256x128xbf16>, vector<2x128xf32> -> vector<2x128xf32>
    %c0_24 = arith.constant 0 : index
    %c0_25 = arith.constant 0 : index
    %72 = vector.load %arg6[%c0_24, %c0_25] : memref<1x128xf32, #tpu.memory_space<vmem>>, vector<1x128xf32>
    %73 = vector.broadcast %72 : vector<1x128xf32> to vector<2x128xf32>
    %74 = arith.addf %71, %73 : vector<2x128xf32>
    %c0_26 = arith.constant 0 : index
    %c0_27 = arith.constant 0 : index
    %75 = vector.load %arg7[%c0_26, %c0_27] : memref<2x128xf32, #tpu.memory_space<vmem>>, vector<2x128xf32>
    tpu.vector_store %arg7[%c0_26, %c0_27], %74 {strides = array<i32>} : memref<2x128xf32, #tpu.memory_space<vmem>>, vector<2x128xf32>,
    return
  }
}

</mosaic_0001>

<bundles_post_ra>
// kernel: tpu_custom_call.1
= control target key start
LH: loop header
LB: loop body
LE: loop exit
PB: predicated region body
PF: predicated region fallthrough
CT: control target
= control target key end

     0   :  { %12 = vsyncpa [#allocation3], 0  ;;  %s2592_s0 = inlined_call_operand.hbm [shape: f32[2,6], index: 0, kind: input, shape index: {}]   ;;  %s2593_s1 = inlined_call_operand.hbm [shape: f32[6,768], index: 1, kind: input, shape index: {}]   ;;  %s2594_s2 = inlined_call_operand.vmem [shape: f32[1,768], index: 2, kind: input, shape index: {}]   ;;  %s2595_s3 = inlined_call_operand.hbm [shape: bf16[256,768], index: 3, kind: input, shape index: {}]   ;;  %s2596_s4 = inlined_call_operand.vmem [shape: f32[1,768], index: 4, kind: input, shape index: {}]   ;;  %s2597_s5 = inlined_call_operand.hbm [shape: bf16[256,128], index: 5, kind: input, shape index: {}]   ;;  %s2598_s6 = inlined_call_operand.vmem [shape: f32[1,128], index: 6, kind: input, shape index: {}]   ;;  %s2599_s7 = inlined_call_operand.hbm [shape: f32[2,128], index: 7, kind: output, shape index: {}]  }
   0x1   :  { %13 = vsyncpa [#allocation6], 0 }
   0x2   :  { %14 = vsyncpa [#allocation9], 0 }
   0x3   :  { %15 = vsyncpa [#allocation4], 0  ;;  %s2019_s24 = smov [#allocation5]   ;;  %s2020_s26 = smov [#allocation2]  }
   0x4   :  { %s32_s25 = sshll.u32 %s2019_s24, 4  ;;  %s22_s27 = sshll.u32 %s2020_s26, 4  ;;  %s33_s25 = int_to_ptr.vmem [resolvable:$true] %s32_s25  ;;  %s23_s27 = int_to_ptr.vmem [resolvable:$true] %s22_s27 }
   0x5   :  { %s1901_s30 = scalar_lea.hbm %s2593_s1, 768 }
   0x6   :  { %p1902_p0 = scmp.ne.s32.totalorder %s2593_s1, %s1901_s30  ;;  %p1905_p1 = scmp.lt.u32.totalorder %s1901_s30, %s2593_s1 }
   0x8   :  { %p1907_p2 = pnand %p1905_p1, %p1902_p0 }
   0xa   :  { %1910 = shalt.err (!%p1907_p2)
}
   0xb   :  { %s1911_s12 = scalar_lea.vmem %s33_s25, 768  ;;  %p1916_p4 = scmp.lt.s32.totalorder %s33_s25, %s33_s25 }
   0xc   :  { %p1912_p3 = scmp.ne.s32.totalorder %s33_s25, %s1911_s12  ;;  %p1917_p5 = scmp.lt.s32.totalorder %s1911_s12, %s1911_s12 }
   0xe   :  { %p1918_p6 = por %p1917_p5, %p1916_p4 }
  0x10   :  { %p1919_p7 = pnand %p1918_p6, %p1912_p3 }
  0x12   :  { %1922 = shalt.err (!%p1919_p7)
}
  0x13   :  { %35 = dma.hbm_to_vmem [thread:$0]  %s2593_s1, 768, %s33_s25, [#allocation6]  }
  0x14   :  { %s1923_s17 = scalar_lea.hbm %s2592_s0, 32 }
  0x15   :  { %p1924_p8 = scmp.ne.s32.totalorder %s2592_s0, %s1923_s17  ;;  %p1927_p9 = scmp.lt.u32.totalorder %s1923_s17, %s2592_s0 }
  0x17   :  { %p1929_p10 = pnand %p1927_p9, %p1924_p8 }
  0x19   :  { %1932 = shalt.err (!%p1929_p10)
}
  0x1a   :  { %s1933_s22 = scalar_lea.vmem %s23_s27, 32  ;;  %p1938_p12 = scmp.lt.s32.totalorder %s23_s27, %s23_s27 }
  0x1b   :  { %p1934_p11 = scmp.ne.s32.totalorder %s23_s27, %s1933_s22  ;;  %p1939_p13 = scmp.lt.s32.totalorder %s1933_s22, %s1933_s22 }
  0x1d   :  { %p1940_p0 = por %p1939_p13, %p1938_p12 }
  0x1f   :  { %p1941_p1 = pnand %p1940_p0, %p1934_p11 }
  0x21   :  { %1944 = shalt.err (!%p1941_p1)
}
  0x22   :  { %25 = dma.hbm_to_vmem [thread:$0]  %s2592_s0, 32, %s23_s27, [#allocation3]  }
  0x23   :  { %s2021_s24 = smov [#allocation7]   ;;  %s1945_s29 = scalar_lea.hbm %s2595_s3, 12288 }
  0x24   :  { %s43_s25 = sshll.u32 %s2021_s24, 4  ;;  %p1946_p2 = scmp.ne.s32.totalorder %s2595_s3, %s1945_s29  ;;  %s44_s25 = int_to_ptr.vmem [resolvable:$true] %s43_s25 }
  0x25   :  { %p1949_p3 = scmp.lt.u32.totalorder %s1945_s29, %s2595_s3 }
  0x27   :  { %p1951_p4 = pnand %p1949_p3, %p1946_p2 }
  0x29   :  { %1954 = shalt.err (!%p1951_p4)
}
  0x2a   :  { %s1955_s11 = scalar_lea.vmem %s44_s25, 12288  ;;  %p1960_p6 = scmp.lt.s32.totalorder %s44_s25, %s44_s25 }
  0x2b   :  { %p1956_p5 = scmp.ne.s32.totalorder %s44_s25, %s1955_s11  ;;  %p1961_p7 = scmp.lt.s32.totalorder %s1955_s11, %s1955_s11 }
  0x2d   :  { %p1962_p8 = por %p1961_p7, %p1960_p6 }
  0x2f   :  { %p1963_p9 = pnand %p1962_p8, %p1956_p5 }
  0x31   :  { %1966 = shalt.err (!%p1963_p9)
}
  0x32   :  { %s2022_s0 = smov 384   ;;  %s2023_s27 = smov 24  }
  0x33   :  { %49 = dma.hbm_to_vmem [thread:$0]  %s2595_s3, 12288, %s44_s25, [#allocation6], %s2022_s0, %s2022_s0, %s2023_s27  }
  0x34   :  { %s2024_s14 = smov [#allocation8]   ;;  %s1967_s18 = scalar_lea.hbm %s2597_s5, 2048 }
  0x35   :  { %s57_s15 = sshll.u32 %s2024_s14, 4  ;;  %p1968_p10 = scmp.ne.s32.totalorder %s2597_s5, %s1967_s18  ;;  %s58_s15 = int_to_ptr.vmem [resolvable:$true] %s57_s15 }
  0x36   :  { %p1971_p11 = scmp.lt.u32.totalorder %s1967_s18, %s2597_s5 }
  0x38   :  { %p1973_p12 = pnand %p1971_p11, %p1968_p10 }
  0x3a   :  { %1976 = shalt.err (!%p1973_p12)
}
  0x3b   :  { %s1977_s1 = scalar_lea.vmem %s58_s15, 2048  ;;  %p1982_p0 = scmp.lt.s32.totalorder %s58_s15, %s58_s15 }
  0x3c   :  { %p1978_p13 = scmp.ne.s32.totalorder %s58_s15, %s1977_s1  ;;  %p1983_p1 = scmp.lt.s32.totalorder %s1977_s1, %s1977_s1 }
  0x3e   :  { %p1984_p2 = por %p1983_p1, %p1982_p0 }
  0x40   :  { %p1985_p3 = pnand %p1984_p2, %p1978_p13 }
  0x42   :  { %1988 = shalt.err (!%p1985_p3)
}
  0x43   :  { %s2025_s3 = smov 64   ;;  %s2026_s23 = smov 4  }
  0x44   :  { %63 = dma.hbm_to_vmem [thread:$0]  %s2597_s5, 2048, %s58_s15, [#allocation9], %s2025_s3, %s2025_s3, %s2026_s23  }
  0x45   :  { %2011 = dma.done.wait [#allocation3], 32  }
  0x46   :  { %2012 = vsyncadd [#allocation3], 4294967264 }
  0x47   :  { %2013 = dma.done.wait [#allocation6], 13056  }
  0x48   :  { %2014 = vsyncadd [#allocation6], 4294954240 }
  0x49   :  { %2015 = dma.done.wait [#allocation9], 2048  }
  0x4a   :  { %2016 = vsyncadd [#allocation9], 4294965248  ;;  %v2027_v0 = vmov 0.0   ;;  %vm122_vm0 = vcmask 1045504   ;;  %vm118_vm1 = vcmask 48128   ;;  %s2028_s30 = smov [#allocation10]  }
  0x4b   :  { %205 = vmatprep.mubr.f32.mxu0 %v2027_v0  ;;  %v81_v1 = vld [vmem:[#allocation5 + $0x8] sm:$0x3f]  ;;  %v80_v2 = vld [vmem:[#allocation5] sm:$0x3f]  ;;  %v79_v3 = vld [vmem:[#allocation2] sm:$0x3] }
  0x4c   :  { %1503 = vmatprep.subr.msk.mxu0 %vm122_vm0, %v81_v1  ;;  %v83_v4 = vld [vmem:[#allocation5 + $0x18] sm:$0x3f]  ;;  %v82_v5 = vld [vmem:[#allocation5 + $0x10] sm:$0x3f]  ;;  %v85_v6 = vld [vmem:[#allocation5 + $0x28] sm:$0x3f] }
  0x4d   :  { %1504 = vmatpush1.msk.msra.mxu0 %vm122_vm0, %v80_v2  ;;  %v2121_v7 = vld [vmem:[#allocation7 + $0x4] ss:$24 sps:$4 sm:$0xff]   ;;  %v2123_v8 = vld [vmem:[#allocation7] ss:$24 sps:$4 sm:$0xff]   ;;  %v84_v9 = vld [vmem:[#allocation5 + $0x20] sm:$0x3f] }
  0x4e   :  { %1505 = vmatmul.mubr.msk.f32.vlgmr.msra.gmra.mrb[0].mxu0 %vm118_vm1, %v79_v3  ;;  %1506 = vmatprep.subr.msk.mxu0 %vm122_vm0, %v83_v4  ;;  %v2126_v10 = vld [vmem:[#allocation7 + $0xc] ss:$24 sps:$4 sm:$0xff]   ;;  %v2133_v12 = vld [vmem:[#allocation7 + $0x30] ss:$24 sps:$4 sm:$0xff]   ;;  %v2143_v15 = vld [vmem:[#allocation7 + $0x3c] ss:$24 sps:$4 sm:$0xff]  }
  0x4f   :  { %1507 = vmatpush1.msk.msra.mxu0 %vm122_vm0, %v82_v5  ;;  %276 = vmatprep.mubr.f32.mxu0 %v2027_v0  ;;  %v2130_v11 = vld [vmem:[#allocation7 + $0x34] ss:$24 sps:$4 sm:$0xff]   ;;  %v2138_v13 = vld [vmem:[#allocation7 + $0x8] ss:$24 sps:$4 sm:$0xff]   ;;  %v2140_v14 = vld [vmem:[#allocation7 + $0x64] ss:$24 sps:$4 sm:$0xff]  }
  0x50   :  { %1509 = vmatprep.subr.msk.mxu0 %vm122_vm0, %v85_v6  ;;  %996 = vmatprep.subr.bf16.mxu1 %v2121_v7  ;;  %v2146_v16 = vld [vmem:[#allocation7 + $0x60] ss:$24 sps:$4 sm:$0xff]   ;;  %v2150_v17 = vld [vmem:[#allocation7 + $0x94] ss:$24 sps:$4 sm:$0xff]   ;;  %v2158_v20 = vld [vmem:[#allocation7 + $0x90] ss:$24 sps:$4 sm:$0xff]  }
  0x51   :  { %997 = vmatpush1.bf16.msra.mxu1 %v2123_v8  ;;  %v2153_v18 = vld [vmem:[#allocation7 + $0x38] ss:$24 sps:$4 sm:$0xff]   ;;  %v2155_v19 = vld [vmem:[#allocation7 + $0x6c] ss:$24 sps:$4 sm:$0xff]   ;;  %v2161_v21 = vld [vmem:[#allocation7 + $0x68] ss:$24 sps:$4 sm:$0xff]  }
  0x52   :  { %1508 = vmatmul.mubr.msk.f32.vlgmr.msra.gmra.mrb[2].mxu0 %vm118_vm1, %v79_v3  ;;  %998 = vmatprep.subr.bf16.mxu1 %v2130_v11  ;;  %v2163_v22 = vld [vmem:[#allocation7 + $0xc4] ss:$24 sps:$4 sm:$0xff]   ;;  %v2171_v24 = vld [vmem:[#allocation7 + $0x98] ss:$24 sps:$4 sm:$0xff]   ;;  %v2181_v27 = vld [vmem:[#allocation7 + $0xc8] ss:$24 sps:$4 sm:$0xff]  }
  0x53   :  { %1510 = vmatpush1.msk.msra.mxu0 %vm122_vm0, %v84_v9  ;;  %347 = vmatprep.mubr.f32.mxu0 %v2027_v0  ;;  %v2166_v23 = vld [vmem:[#allocation7 + $0x9c] ss:$24 sps:$4 sm:$0xff]   ;;  %v2177_v25 = vld [vmem:[#allocation7 + $0xc0] ss:$24 sps:$4 sm:$0xff]   ;;  %v2179_v26 = vld [vmem:[#allocation7 + $0xcc] ss:$24 sps:$4 sm:$0xff]  }
  0x54   :  { %1037 = vmatprep.subr.bf16.mxu0 %v2126_v10  ;;  %v2186_v28 = vld [vmem:[#allocation7 + $0xf4] ss:$24 sps:$4 sm:$0xff]   ;;  %v2188_v29 = vld [vmem:[#allocation7 + $0xf0] ss:$24 sps:$4 sm:$0xff]   ;;  %v2198_v32 = vld [vmem:[#allocation7 + $0x124] ss:$24 sps:$4 sm:$0xff]  }
  0x55   :  { %999 = vmatpush1.bf16.msra.mxu1 %v2133_v12  ;;  %v2190_v30 = vld [vmem:[#allocation7 + $0xfc] ss:$24 sps:$4 sm:$0xff]   ;;  %v2193_v31 = vld [vmem:[#allocation7 + $0xf8] ss:$24 sps:$4 sm:$0xff]   ;;  %v2202_v34 = vld [vmem:[#allocation7 + $0x12c] ss:$24 sps:$4 sm:$0xff]  }
  0x56   :  { %1511 = vmatmul.mubr.msk.f32.vlgmr.msra.gmra.mrb[4].mxu0 %vm118_vm1, %v79_v3  ;;  %1000 = vmatprep.subr.bf16.mxu1 %v2140_v14  ;;  %2629 = vst [vmem:[#allocation15_spill] sm:$0xff] %v2190_v30  ;;  %2630 = vst [vmem:[#allocation16_spill] sm:$0xff] %v2193_v31  ;;  %v2200_v33 = vld [vmem:[#allocation7 + $0x120] ss:$24 sps:$4 sm:$0xff]   ;;  %v2210_v36 = vld [vmem:[#allocation7 + $0x154] ss:$24 sps:$4 sm:$0xff]  }
  0x57   :  { %1038 = vmatpush1.bf16.msra.mxu0 %v2138_v13  ;;  %2631 = vst [vmem:[#allocation17_spill] sm:$0xff] %v2202_v34  ;;  %v2205_v35 = vld [vmem:[#allocation7 + $0x128] ss:$24 sps:$4 sm:$0xff]   ;;  %v2214_v38 = vld [vmem:[#allocation7 + $0x15c] ss:$24 sps:$4 sm:$0xff]   ;;  %s1492_s8 = sshll.u32 %s2028_s30, 4  ;;  %s1493_s8 = int_to_ptr.vmem [resolvable:$true] %s1492_s8 }
  0x58   :  { %1039 = vmatprep.subr.bf16.mxu0 %v2143_v15  ;;  %2632 = vst [vmem:[#allocation18_spill] sm:$0xff] %v2205_v35  ;;  %v2212_v37 = vld [vmem:[#allocation7 + $0x150] ss:$24 sps:$4 sm:$0xff]   ;;  %2633 = vst [vmem:[#allocation19_spill] sm:$0xff] %v2214_v38  ;;  %v2222_v40 = vld [vmem:[#allocation7 + $0x184] ss:$24 sps:$4 sm:$0xff]   ;;  %p1994_p5 = scmp.lt.s32.totalorder %s1493_s8, %s1493_s8 }
  0x59   :  { %1001 = vmatpush1.bf16.msra.mxu1 %v2146_v16  ;;  %v2217_v39 = vld [vmem:[#allocation7 + $0x158] ss:$24 sps:$4 sm:$0xff]   ;;  %v2226_v42 = vld [vmem:[#allocation7 + $0x18c] ss:$24 sps:$4 sm:$0xff]   ;;  %v2229_v43 = vld [vmem:[#allocation7 + $0x188] ss:$24 sps:$4 sm:$0xff]  }
  0x5a   :  { %1002 = vmatprep.subr.bf16.mxu1 %v2150_v17  ;;  %2634 = vst [vmem:[#allocation20_spill] sm:$0xff] %v2217_v39  ;;  %v2224_v41 = vld [vmem:[#allocation7 + $0x180] ss:$24 sps:$4 sm:$0xff]   ;;  %2635 = vst [vmem:[#allocation21_spill] sm:$0xff] %v2226_v42  ;;  %v2234_v44 = vld [vmem:[#allocation7 + $0x1b4] ss:$24 sps:$4 sm:$0xff]  }
  0x5b   :  { %1040 = vmatpush1.bf16.msra.mxu0 %v2153_v18  ;;  %2636 = vst [vmem:[#allocation22_spill] sm:$0xff] %v2229_v43  ;;  %v2236_v45 = vld [vmem:[#allocation7 + $0x1b0] ss:$24 sps:$4 sm:$0xff]   ;;  %v2238_v46 = vld [vmem:[#allocation7 + $0x1bc] ss:$24 sps:$4 sm:$0xff]   ;;  %s1989_s9 = scalar_lea.vmem %s1493_s8, 32 }
  0x5c   :  { %1041 = vmatprep.subr.bf16.mxu0 %v2155_v19  ;;  %2637 = vst [vmem:[#allocation23_spill] sm:$0xff] %v2238_v46  ;;  %v2241_v47 = vld [vmem:[#allocation7 + $0x1b8] ss:$24 sps:$4 sm:$0xff]   ;;  %v2246_v48 = vld [vmem:[#allocation7 + $0x1e4] ss:$24 sps:$4 sm:$0xff]   ;;  %p1990_p4 = scmp.ne.s32.totalorder %s1493_s8, %s1989_s9  ;;  %p1995_p6 = scmp.lt.s32.totalorder %s1989_s9, %s1989_s9 }
  0x5d   :  { %1003 = vmatpush1.bf16.msra.mxu1 %v2158_v20  ;;  %2638 = vst [vmem:[#allocation24_spill] sm:$0xff] %v2241_v47  ;;  %v2248_v49 = vld [vmem:[#allocation7 + $0x1e0] ss:$24 sps:$4 sm:$0xff]   ;;  %v2250_v50 = vld [vmem:[#allocation7 + $0x1ec] ss:$24 sps:$4 sm:$0xff]  }
  0x5e   :  { %1004 = vmatprep.subr.bf16.mxu1 %v2163_v22  ;;  %2639 = vst [vmem:[#allocation25_spill] sm:$0xff] %v2250_v50  ;;  %v2253_v51 = vld [vmem:[#allocation7 + $0x1e8] ss:$24 sps:$4 sm:$0xff]   ;;  %v2258_v52 = vld [vmem:[#allocation7 + $0x214] ss:$24 sps:$4 sm:$0xff]   ;;  %p1996_p7 = por %p1995_p6, %p1994_p5 }
  0x5f   :  { %1042 = vmatpush1.bf16.msra.mxu0 %v2161_v21  ;;  %2640 = vst [vmem:[#allocation26_spill] sm:$0xff] %v2253_v51  ;;  %v2260_v53 = vld [vmem:[#allocation7 + $0x210] ss:$24 sps:$4 sm:$0xff]   ;;  %v2262_v54 = vld [vmem:[#allocation7 + $0x21c] ss:$24 sps:$4 sm:$0xff]  }
  0x60   :  { %1043 = vmatprep.subr.bf16.mxu0 %v2166_v23  ;;  %2641 = vst [vmem:[#allocation27_spill] sm:$0xff] %v2262_v54  ;;  %v2265_v55 = vld [vmem:[#allocation7 + $0x218] ss:$24 sps:$4 sm:$0xff]   ;;  %v2270_v56 = vld [vmem:[#allocation7 + $0x244] ss:$24 sps:$4 sm:$0xff]   ;;  %p1997_p8 = pnand %p1996_p7, %p1990_p4 }
  0x61   :  { %1005 = vmatpush1.bf16.msra.mxu1 %v2177_v25  ;;  %2642 = vst [vmem:[#allocation28_spill] sm:$0xff] %v2265_v55  ;;  %v2272_v57 = vld [vmem:[#allocation7 + $0x240] ss:$24 sps:$4 sm:$0xff]   ;;  %v2274_v58 = vld [vmem:[#allocation7 + $0x24c] ss:$24 sps:$4 sm:$0xff]  }
  0x62   :  { %1006 = vmatprep.subr.bf16.mxu1 %v2186_v28  ;;  %2643 = vst [vmem:[#allocation29_spill] sm:$0xff] %v2274_v58  ;;  %v2277_v59 = vld [vmem:[#allocation7 + $0x248] ss:$24 sps:$4 sm:$0xff]   ;;  %v2281_v60 = vld [vmem:[#allocation7 + $0x274] ss:$24 sps:$4 sm:$0xff]  }
  0x63   :  { %1044 = vmatpush1.bf16.msra.mxu0 %v2171_v24  ;;  %2644 = vst [vmem:[#allocation30_spill] sm:$0xff] %v2277_v59  ;;  %v2283_v61 = vld [vmem:[#allocation7 + $0x270] ss:$24 sps:$4 sm:$0xff]   ;;  %v2288_v63 = vld [vmem:[#allocation7 + $0x27c] ss:$24 sps:$4 sm:$0xff]  }
  0x64   :  { %1045 = vmatprep.subr.bf16.mxu0 %v2179_v26  ;;  %v2286_v62 = vld [vmem:[#allocation7 + $0x278] ss:$24 sps:$4 sm:$0xff]   ;;  %2646 = vst [vmem:[#allocation32_spill] sm:$0xff] %v2288_v63  ;;  %v2290_v0 = vld [vmem:[#allocation7 + $0x2a4] ss:$24 sps:$4 sm:$0xff]  }
  0x65   :  { %1007 = vmatpush1.bf16.msra.mxu1 %v2188_v29  ;;  %2645 = vst [vmem:[#allocation31_spill] sm:$0xff] %v2286_v62  ;;  %v2293_v1 = vld [vmem:[#allocation7 + $0x2ac] ss:$24 sps:$4 sm:$0xff]   ;;  %v2297_v2 = vld [vmem:[#allocation7 + $0x2a0] ss:$24 sps:$4 sm:$0xff]  }
  0x66   :  { %1008 = vmatprep.subr.bf16.mxu1 %v2198_v32  ;;  %2647 = vst [vmem:[#allocation33_spill] sm:$0xff] %v2293_v1  ;;  %v2301_v3 = vld [vmem:[#allocation7 + $0x2a8] ss:$24 sps:$4 sm:$0xff]   ;;  %v2303_v4 = vld [vmem:[#allocation7 + $0x2d4] ss:$24 sps:$4 sm:$0xff]  }
  0x67   :  { %1046 = vmatpush1.bf16.msra.mxu0 %v2181_v27  ;;  %2648 = vst [vmem:[#allocation34_spill] sm:$0xff] %v2301_v3  ;;  %v2306_v5 = vld [vmem:[#allocation7 + $0x2dc] ss:$24 sps:$4 sm:$0xff]   ;;  %v2309_v6 = vld [vmem:[#allocation7 + $0x2d0] ss:$24 sps:$4 sm:$0xff]  }
  0x68   :  { %1047 = vmatprep.subr.bf16.mxu0 %v2190_v30  ;;  %2649 = vst [vmem:[#allocation35_spill] sm:$0xff] %v2306_v5  ;;  %v2313_v9 = vld [vmem:[#allocation7 + $0x2d8] ss:$24 sps:$4 sm:$0xff]  }
  0x69   :  { %1009 = vmatpush1.bf16.msra.mxu1 %v2200_v33  ;;  %2650 = vst [vmem:[#allocation36_spill] sm:$0xff] %v2313_v9 }
  0x6a   :  { %1010 = vmatprep.subr.bf16.mxu1 %v2210_v36 }
  0x6b   :  { %1048 = vmatpush1.bf16.msra.mxu0 %v2193_v31 }
  0x6c   :  { %1049 = vmatprep.subr.bf16.mxu0 %v2202_v34 }
  0x6d   :  { %1011 = vmatpush1.bf16.msra.mxu1 %v2212_v37 }
  0x6e   :  { %1012 = vmatprep.subr.bf16.mxu1 %v2222_v40 }
  0x6f   :  { %1050 = vmatpush1.bf16.msra.mxu0 %v2205_v35 }
  0x70   :  { %1051 = vmatprep.subr.bf16.mxu0 %v2214_v38 }
  0x71   :  { %1013 = vmatpush1.bf16.msra.mxu1 %v2224_v41 }
  0x72   :  { %1014 = vmatprep.subr.bf16.mxu1 %v2234_v44 }
  0x73   :  { %1052 = vmatpush1.bf16.msra.mxu0 %v2217_v39 }
  0x74   :  { %1053 = vmatprep.subr.bf16.mxu0 %v2226_v42 }
  0x75   :  { %1015 = vmatpush1.bf16.msra.mxu1 %v2236_v45 }
  0x76   :  { %1016 = vmatprep.subr.bf16.mxu1 %v2246_v48 }
  0x77   :  { %1054 = vmatpush1.bf16.msra.mxu0 %v2229_v43 }
  0x78   :  { %1055 = vmatprep.subr.bf16.mxu0 %v2238_v46 }
  0x79   :  { %1017 = vmatpush1.bf16.msra.mxu1 %v2248_v49 }
  0x7a   :  { %1018 = vmatprep.subr.bf16.mxu1 %v2258_v52 }
  0x7b   :  { %1056 = vmatpush1.bf16.msra.mxu0 %v2241_v47 }
  0x7c   :  { %1057 = vmatprep.subr.bf16.mxu0 %v2250_v50 }
  0x7d   :  { %1019 = vmatpush1.bf16.msra.mxu1 %v2260_v53 }
  0x7e   :  { %1020 = vmatprep.subr.bf16.mxu1 %v2270_v56 }
  0x7f   :  { %1058 = vmatpush1.bf16.msra.mxu0 %v2253_v51 }
  0x80   :  { %1059 = vmatprep.subr.bf16.mxu0 %v2262_v54 }
  0x81   :  { %1021 = vmatpush1.bf16.msra.mxu1 %v2272_v57 }
  0x82   :  { %1022 = vmatprep.subr.bf16.mxu1 %v2281_v60 }
  0x83   :  { %1060 = vmatpush1.bf16.msra.mxu0 %v2265_v55 }
  0x84   :  { %1061 = vmatprep.subr.bf16.mxu0 %v2274_v58 }
  0x85   :  { %1023 = vmatpush1.bf16.msra.mxu1 %v2283_v61 }
  0x86   :  { %1024 = vmatprep.subr.bf16.mxu1 %v2290_v0 }
  0x87   :  { %1062 = vmatpush1.bf16.msra.mxu0 %v2277_v59  ;;  %v86_v59 = vld [vmem:[%s2594_s2] sm:$0x3f] }
  0x88   :  { %1063 = vmatprep.subr.bf16.mxu0 %v2288_v63 }
  0x89   :  { %1025 = vmatpush1.bf16.msra.mxu1 %v2297_v2 }
  0x8a   :  { %1026 = vmatprep.subr.bf16.mxu1 %v2303_v4 }
  0x8b   :  { %1064 = vmatpush1.bf16.msra.mxu0 %v2286_v62  ;;  %v2318_v62 = vld [vmem:[#allocation7 + $0x14] ss:$24 sps:$4 sm:$0xff]  }
  0x8c   :  { %1065 = vmatprep.subr.bf16.mxu0 %v2293_v1  ;;  %v88_v1 = vlaneseq }
  0x8d   :  { %1027 = vmatpush1.bf16.msra.mxu1 %v2309_v6 }
  0x8e   :  { %1078 = vmatprep.subr.bf16.mxu1 %v2318_v62  ;;  %v2322_v63 = vshrl.u32 %v88_v1, 7 }
  0x8f   :  { %1066 = vmatpush1.bf16.msra.mxu0 %v2301_v3 }
  0x90   :  { %1067 = vmatprep.subr.bf16.mxu0 %v2306_v5  ;;  %2651 = vst [vmem:[#allocation37_spill] sm:$0xff] %v2322_v63  ;;  %v2617_v3 = vsub.s32 0, %v2322_v63  ;;  %v2618_v5 = vsub.s32 1, %v2322_v63  ;;  %v2623_v1 = vsub.s32 4, %v2322_v63  ;;  %v2625_v50 = vsub.s32 5, %v2322_v63 }
  0x91   :  { %v2626_v43 = vsub.s32 2, %v2322_v63  ;;  %v102_v39 = vsub.s32 3, %v2322_v63 }
  0x92   :  { %v95_v58 = vrot.slane %v86_v59, %v2618_v5  ;;  %v107_v5 = vrot.slane %v86_v59, %v2623_v1 }
  0x93   :  { %1068 = vmatpush1.bf16.msra.mxu0 %v2313_v9  ;;  %v91_v9 = vrot.slane %v86_v59, %v2617_v3 }
  0x94   :  { %1153 = vmatprep.subr.bf16.mxu0 %v2121_v7 }
 0x121   :  { %v207_v7 = vpop.f32.mrb[0].mxu0 }
 0x122   :  { %v208_v55 = vadd.f32 %v207_v7, %v91_v9  ;;  %v209_v54 = vpop.f32.mrb[1].mxu0  ;;  %v111_v9 = vrot.slane %v86_v59, %v2625_v50 }
 0x123   :  { %v210_v51 = vadd.f32 %v209_v54, %v95_v58  ;;  %v99_v54 = vrot.slane %v86_v59, %v2626_v43 }
 0x124   :  { %v1512_v47 = vmul.f32 -1.442695, %v208_v55 }
 0x125   :  { %v1513_v46 = vmul.f32 -1.442695, %v210_v51  ;;  %v278_v42 = vpop.f32.mrb[2].mxu0  ;;  %v103_v51 = vrot.slane %v86_v59, %v102_v39 }
 0x126   :  { %1829 = vpow2.f32 %v1512_v47  ;;  %v280_v3 = vpop.f32.mrb[3].mxu0  ;;  %v279_v35 = vadd.f32 %v278_v42, %v99_v54 }
 0x127   :  { %1831 = vpow2.f32 %v1513_v46  ;;  %v281_v31 = vadd.f32 %v280_v3, %v103_v51  ;;  %v2345_v51 = vld [vmem:[#allocation7 + $0x10] ss:$24 sps:$4 sm:$0xff]  }
 0x129   :  { %v349_v58 = vpop.f32.mrb[4].mxu0 }
 0x12a   :  { %v350_v55 = vadd.f32 %v349_v58, %v107_v5  ;;  %v351_v7 = vpop.f32.mrb[5].mxu0 }
 0x12b   :  { %v352_v47 = vadd.f32 %v351_v7, %v111_v9  ;;  %v2354_v7 = vld [vmem:[#allocation7 + $0x40] ss:$24 sps:$4 sm:$0xff]  }
 0x12c   :  { %v1514_v38 = vmul.f32 -1.442695, %v350_v55 }
 0x12d   :  { %v1515_v34 = vmul.f32 -1.442695, %v352_v47  ;;  %v2357_v47 = vld [vmem:[#allocation7 + $0x74] ss:$24 sps:$4 sm:$0xff]  }
 0x12e   :  { %1833 = vpow2.f32 %v1514_v38 }
 0x12f   :  { %1835 = vpow2.f32 %v1515_v34 }
 0x130   :  { %v1830_v46 = vpop.eup %1829  ;;  %1837 = vtanh.f32 %v279_v35 }
 0x131   :  { %v1832_v1 = vpop.eup %1831  ;;  %v360_v30 = vadd.f32 1.0, %v1830_v46  ;;  %1839 = vtanh.f32 %v281_v31  ;;  %v2362_v46 = vld [vmem:[#allocation7 + $0x70] ss:$24 sps:$4 sm:$0xff]  }
 0x132   :  { %v361_v50 = vadd.f32 1.0, %v1832_v1 }
 0x133   :  { %1841 = vrcp.f32 %v360_v30 }
 0x134   :  { %1843 = vrcp.f32 %v361_v50 }
 0x138   :  { %v1834_v43 = vpop.eup %1833 }
 0x139   :  { %v1836_v63 = vpop.eup %1835  ;;  %v374_v59 = vadd.f32 1.0, %v1834_v43 }
 0x13a   :  { %v1838_v5 = vpop.eup %1837  ;;  %v375_v58 = vadd.f32 1.0, %v1836_v63  ;;  %v2349_v63 = vld [vmem:[#allocation7 + $0x44] ss:$24 sps:$4 sm:$0xff]  }
 0x13b   :  { %v1840_v9 = vpop.eup %1839  ;;  %1845 = vrcp.f32 %v374_v59  ;;  %v2365_v59 = vld [vmem:[#allocation7 + $0xa4] ss:$24 sps:$4 sm:$0xff]  }
 0x13c   :  { %1847 = vrcp.f32 %v375_v58  ;;  %v2670_v58 = vld [vmem:[#allocation33_spill] sm:$0xff] }
 0x13d   :  { %v1842_v55 = vpop.eup %1841 }
 0x13e   :  { %v1844_v42 = vpop.eup %1843  ;;  %v380_v54 = vmul.f32 %v1842_v55, %v1838_v5  ;;  %v2370_v5 = vld [vmem:[#allocation7 + $0xa0] ss:$24 sps:$4 sm:$0xff]  }
 0x13f   :  { %v381_v38 = vmul.f32 %v1844_v42, %v1840_v9  ;;  %v2671_v9 = vld [vmem:[#allocation34_spill] sm:$0xff]  ;;  %v2672_v55 = vld [vmem:[#allocation35_spill] sm:$0xff]  ;;  %v2673_v42 = vld [vmem:[#allocation36_spill] sm:$0xff] }
 0x140   :  { %1849 = vtanh.f32 %v380_v54  ;;  %v484_v54 = vld [vmem:[%s2596_s4] sm:$0x3f] }
 0x141   :  { %1851 = vtanh.f32 %v381_v38  ;;  %v2674_v38 = vld [vmem:[#allocation37_spill] sm:$0xff] }
 0x145   :  { %v1846_v34 = vpop.eup %1845 }
 0x146   :  { %v1848_v35 = vpop.eup %1847 }
 0x14a   :  { %v1850_v3 = vpop.eup %1849 }
 0x14b   :  { %v1852_v31 = vpop.eup %1851  ;;  %v384_v30 = vmul.f32 %v1850_v3, %v1846_v34  ;;  %v2675_v34 = vsub.s32 0, %v2674_v38  ;;  %v2676_v3 = vsub.s32 1, %v2674_v38 }
 0x14c   :  { %v385_v50 = vmul.f32 %v1852_v31, %v1848_v35 }
 0x14d   :  { %v2347_v43 = vpack.c.bf16 %v384_v30, %v384_v30  ;;  %v2512_v35 = vrot.slane %v484_v54, %v2675_v34  ;;  %v2516_v31 = vrot.slane %v484_v54, %v2676_v3 }
 0x14e   :  { %v387_v1 = vpack.c.bf16 %v385_v50, %v385_v50 }
 0x150   :  { %1028 = vmatprep.mubr.bf16.mxu1 %v387_v1  ;;  %1069 = vmatprep.mubr.bf16.mxu0 %v387_v1 }
 0x151   :  { %1029 = vmatmul.mubr.bf16.vlgmr.msra.gmra.mrb[0].mxu1 %v2347_v43  ;;  %1070 = vmatmul.mubr.bf16.vlgmr.msra.gmra.mrb[8].mxu0 %v2347_v43 }
 0x152   :  { %1079 = vmatpush1.bf16.msra.mxu1 %v2345_v51  ;;  %1110 = vmatprep.mubr.bf16.mxu1 %v387_v1 }
 0x153   :  { %1080 = vmatprep.subr.bf16.mxu1 %v2349_v63  ;;  %1154 = vmatpush1.bf16.msra.mxu0 %v2123_v8  ;;  %v2373_v8 = vld [vmem:[#allocation7 + $0xd4] ss:$24 sps:$4 sm:$0xff]  }
 0x154   :  { %1155 = vmatprep.subr.bf16.mxu0 %v2130_v11  ;;  %v2378_v11 = vld [vmem:[#allocation7 + $0xd0] ss:$24 sps:$4 sm:$0xff]  }
 0x156   :  { %1081 = vmatpush1.bf16.msra.mxu1 %v2354_v7 }
 0x157   :  { %1082 = vmatprep.subr.bf16.mxu1 %v2357_v47  ;;  %1156 = vmatpush1.bf16.msra.mxu0 %v2133_v12  ;;  %v2381_v12 = vld [vmem:[#allocation7 + $0x104] ss:$24 sps:$4 sm:$0xff]  }
 0x158   :  { %1157 = vmatprep.subr.bf16.mxu0 %v2140_v14  ;;  %v2386_v14 = vld [vmem:[#allocation7 + $0x100] ss:$24 sps:$4 sm:$0xff]  }
 0x15a   :  { %1083 = vmatpush1.bf16.msra.mxu1 %v2362_v46 }
 0x15b   :  { %1084 = vmatprep.subr.bf16.mxu1 %v2365_v59  ;;  %1158 = vmatpush1.bf16.msra.mxu0 %v2146_v16  ;;  %v2389_v16 = vld [vmem:[#allocation7 + $0x134] ss:$24 sps:$4 sm:$0xff]  }
 0x15c   :  { %1159 = vmatprep.subr.bf16.mxu0 %v2150_v17  ;;  %v2394_v17 = vld [vmem:[#allocation7 + $0x130] ss:$24 sps:$4 sm:$0xff]  }
 0x15e   :  { %1085 = vmatpush1.bf16.msra.mxu1 %v2370_v5 }
 0x15f   :  { %1086 = vmatprep.subr.bf16.mxu1 %v2373_v8  ;;  %1160 = vmatpush1.bf16.msra.mxu0 %v2158_v20  ;;  %v2397_v20 = vld [vmem:[#allocation7 + $0x164] ss:$24 sps:$4 sm:$0xff]  }
 0x160   :  { %1161 = vmatprep.subr.bf16.mxu0 %v2163_v22  ;;  %v2402_v22 = vld [vmem:[#allocation7 + $0x160] ss:$24 sps:$4 sm:$0xff]  }
 0x162   :  { %1087 = vmatpush1.bf16.msra.mxu1 %v2378_v11 }
 0x163   :  { %1088 = vmatprep.subr.bf16.mxu1 %v2381_v12  ;;  %1162 = vmatpush1.bf16.msra.mxu0 %v2177_v25  ;;  %v2405_v25 = vld [vmem:[#allocation7 + $0x194] ss:$24 sps:$4 sm:$0xff]  }
 0x164   :  { %1163 = vmatprep.subr.bf16.mxu0 %v2186_v28  ;;  %v2410_v28 = vld [vmem:[#allocation7 + $0x190] ss:$24 sps:$4 sm:$0xff]  }
 0x166   :  { %1089 = vmatpush1.bf16.msra.mxu1 %v2386_v14 }
 0x167   :  { %1090 = vmatprep.subr.bf16.mxu1 %v2389_v16  ;;  %1164 = vmatpush1.bf16.msra.mxu0 %v2188_v29  ;;  %v2413_v29 = vld [vmem:[#allocation7 + $0x1c4] ss:$24 sps:$4 sm:$0xff]  }
 0x168   :  { %1165 = vmatprep.subr.bf16.mxu0 %v2198_v32  ;;  %v2418_v32 = vld [vmem:[#allocation7 + $0x1c0] ss:$24 sps:$4 sm:$0xff]  }
 0x16a   :  { %1091 = vmatpush1.bf16.msra.mxu1 %v2394_v17 }
 0x16b   :  { %1092 = vmatprep.subr.bf16.mxu1 %v2397_v20  ;;  %1166 = vmatpush1.bf16.msra.mxu0 %v2200_v33  ;;  %v2421_v33 = vld [vmem:[#allocation7 + $0x1f4] ss:$24 sps:$4 sm:$0xff]  }
 0x16c   :  { %1167 = vmatprep.subr.bf16.mxu0 %v2210_v36  ;;  %v2426_v36 = vld [vmem:[#allocation7 + $0x1f0] ss:$24 sps:$4 sm:$0xff]  }
 0x16e   :  { %1093 = vmatpush1.bf16.msra.mxu1 %v2402_v22 }
 0x16f   :  { %1094 = vmatprep.subr.bf16.mxu1 %v2405_v25  ;;  %1168 = vmatpush1.bf16.msra.mxu0 %v2212_v37  ;;  %v2429_v37 = vld [vmem:[#allocation7 + $0x224] ss:$24 sps:$4 sm:$0xff]  }
 0x170   :  { %1169 = vmatprep.subr.bf16.mxu0 %v2222_v40  ;;  %v2434_v40 = vld [vmem:[#allocation7 + $0x220] ss:$24 sps:$4 sm:$0xff]  }
 0x172   :  { %1095 = vmatpush1.bf16.msra.mxu1 %v2410_v28 }
 0x173   :  { %1096 = vmatprep.subr.bf16.mxu1 %v2413_v29  ;;  %1170 = vmatpush1.bf16.msra.mxu0 %v2224_v41  ;;  %v2437_v41 = vld [vmem:[#allocation7 + $0x254] ss:$24 sps:$4 sm:$0xff]  }
 0x174   :  { %1171 = vmatprep.subr.bf16.mxu0 %v2234_v44  ;;  %v2442_v44 = vld [vmem:[#allocation7 + $0x250] ss:$24 sps:$4 sm:$0xff]  }
 0x176   :  { %1097 = vmatpush1.bf16.msra.mxu1 %v2418_v32 }
 0x177   :  { %1098 = vmatprep.subr.bf16.mxu1 %v2421_v33  ;;  %1172 = vmatpush1.bf16.msra.mxu0 %v2236_v45  ;;  %v2445_v45 = vld [vmem:[#allocation7 + $0x284] ss:$24 sps:$4 sm:$0xff]  }
 0x178   :  { %1173 = vmatprep.subr.bf16.mxu0 %v2246_v48  ;;  %v2450_v48 = vld [vmem:[#allocation7 + $0x280] ss:$24 sps:$4 sm:$0xff]  }
 0x17a   :  { %1099 = vmatpush1.bf16.msra.mxu1 %v2426_v36 }
 0x17b   :  { %1100 = vmatprep.subr.bf16.mxu1 %v2429_v37  ;;  %1174 = vmatpush1.bf16.msra.mxu0 %v2248_v49  ;;  %v2453_v49 = vld [vmem:[#allocation7 + $0x2b4] ss:$24 sps:$4 sm:$0xff]  }
 0x17c   :  { %1175 = vmatprep.subr.bf16.mxu0 %v2258_v52  ;;  %v2458_v52 = vld [vmem:[#allocation7 + $0x2b0] ss:$24 sps:$4 sm:$0xff]  }
 0x17e   :  { %1101 = vmatpush1.bf16.msra.mxu1 %v2434_v40 }
 0x17f   :  { %1102 = vmatprep.subr.bf16.mxu1 %v2437_v41  ;;  %1176 = vmatpush1.bf16.msra.mxu0 %v2260_v53  ;;  %v2461_v53 = vld [vmem:[#allocation7 + $0x2e4] ss:$24 sps:$4 sm:$0xff]  }
 0x180   :  { %1177 = vmatprep.subr.bf16.mxu0 %v2270_v56  ;;  %v2466_v56 = vld [vmem:[#allocation7 + $0x2e0] ss:$24 sps:$4 sm:$0xff]  }
 0x182   :  { %1103 = vmatpush1.bf16.msra.mxu1 %v2442_v44 }
 0x183   :  { %1104 = vmatprep.subr.bf16.mxu1 %v2445_v45  ;;  %1178 = vmatpush1.bf16.msra.mxu0 %v2272_v57  ;;  %v2653_v57 = vld [vmem:[#allocation16_spill] sm:$0xff] }
 0x184   :  { %1179 = vmatprep.subr.bf16.mxu0 %v2281_v60  ;;  %v2663_v60 = vld [vmem:[#allocation26_spill] sm:$0xff] }
 0x186   :  { %1105 = vmatpush1.bf16.msra.mxu1 %v2450_v48 }
 0x187   :  { %1106 = vmatprep.subr.bf16.mxu1 %v2453_v49  ;;  %1180 = vmatpush1.bf16.msra.mxu0 %v2283_v61  ;;  %v2664_v61 = vld [vmem:[#allocation27_spill] sm:$0xff] }
 0x188   :  { %1181 = vmatprep.subr.bf16.mxu0 %v2290_v0  ;;  %v2666_v0 = vld [vmem:[#allocation29_spill] sm:$0xff] }
 0x18a   :  { %1107 = vmatpush1.bf16.msra.mxu1 %v2458_v52 }
 0x18b   :  { %1108 = vmatprep.subr.bf16.mxu1 %v2461_v53  ;;  %1182 = vmatpush1.bf16.msra.mxu0 %v2297_v2  ;;  %v2667_v2 = vld [vmem:[#allocation30_spill] sm:$0xff] }
 0x18c   :  { %1183 = vmatprep.subr.bf16.mxu0 %v2303_v4  ;;  %v2668_v4 = vld [vmem:[#allocation32_spill] sm:$0xff] }
 0x18e   :  { %1109 = vmatpush1.bf16.msra.mxu1 %v2466_v56 }
 0x18f   :  { %1194 = vmatprep.subr.bf16.mxu1 %v2126_v10  ;;  %1184 = vmatpush1.bf16.msra.mxu0 %v2309_v6  ;;  %v2652_v10 = vld [vmem:[#allocation15_spill] sm:$0xff] }
 0x190   :  { %1235 = vmatprep.subr.bf16.mxu0 %v2318_v62  ;;  %v2665_v62 = vld [vmem:[#allocation28_spill] sm:$0xff]  ;;  %v2669_v6 = vld [vmem:[#allocation31_spill] sm:$0xff] }
 0x191   :  { %1111 = vmatmul.mubr.bf16.vlgmr.msra.gmra.mrb[4].mxu1 %v2347_v43 }
 0x192   :  { %1195 = vmatpush1.bf16.msra.mxu1 %v2138_v13  ;;  %v2654_v13 = vld [vmem:[#allocation17_spill] sm:$0xff] }
 0x193   :  { %1196 = vmatprep.subr.bf16.mxu1 %v2143_v15  ;;  %v2655_v15 = vld [vmem:[#allocation18_spill] sm:$0xff] }
 0x196   :  { %1197 = vmatpush1.bf16.msra.mxu1 %v2153_v18  ;;  %v2656_v18 = vld [vmem:[#allocation19_spill] sm:$0xff] }
 0x197   :  { %1198 = vmatprep.subr.bf16.mxu1 %v2155_v19  ;;  %v2657_v19 = vld [vmem:[#allocation20_spill] sm:$0xff] }
 0x19a   :  { %1199 = vmatpush1.bf16.msra.mxu1 %v2161_v21  ;;  %v2658_v21 = vld [vmem:[#allocation21_spill] sm:$0xff] }
 0x19b   :  { %1200 = vmatprep.subr.bf16.mxu1 %v2166_v23  ;;  %v2659_v23 = vld [vmem:[#allocation22_spill] sm:$0xff] }
 0x19e   :  { %1201 = vmatpush1.bf16.msra.mxu1 %v2171_v24  ;;  %v2660_v24 = vld [vmem:[#allocation23_spill] sm:$0xff] }
 0x19f   :  { %1202 = vmatprep.subr.bf16.mxu1 %v2179_v26  ;;  %v2661_v26 = vld [vmem:[#allocation24_spill] sm:$0xff] }
 0x1a2   :  { %1203 = vmatpush1.bf16.msra.mxu1 %v2181_v27  ;;  %v2662_v27 = vld [vmem:[#allocation25_spill] sm:$0xff] }
 0x1a3   :  { %1204 = vmatprep.subr.bf16.mxu1 %v2652_v10 }
 0x1a6   :  { %1205 = vmatpush1.bf16.msra.mxu1 %v2653_v57 }
 0x1a7   :  { %1206 = vmatprep.subr.bf16.mxu1 %v2654_v13 }
 0x1aa   :  { %1207 = vmatpush1.bf16.msra.mxu1 %v2655_v15 }
 0x1ab   :  { %1208 = vmatprep.subr.bf16.mxu1 %v2656_v18 }
 0x1ae   :  { %1209 = vmatpush1.bf16.msra.mxu1 %v2657_v19 }
 0x1af   :  { %1210 = vmatprep.subr.bf16.mxu1 %v2658_v21 }
 0x1b2   :  { %1211 = vmatpush1.bf16.msra.mxu1 %v2659_v23 }
 0x1b3   :  { %1212 = vmatprep.subr.bf16.mxu1 %v2660_v24  ;;  %v2677_v24 = vsub.s32 2, %v2674_v38 }
 0x1b6   :  { %1213 = vmatpush1.bf16.msra.mxu1 %v2661_v26  ;;  %v2522_v26 = vrot.slane %v484_v54, %v2677_v24 }
 0x1b7   :  { %1214 = vmatprep.subr.bf16.mxu1 %v2662_v27  ;;  %v2526_v27 = vrot.slane %v484_v54, %v102_v39  ;;  %v2678_v39 = vsub.s32 4, %v2674_v38 }
 0x1b9   :  { %v2532_v3 = vrot.slane %v484_v54, %v2678_v39 }
 0x1ba   :  { %1215 = vmatpush1.bf16.msra.mxu1 %v2663_v60 }
 0x1bb   :  { %1216 = vmatprep.subr.bf16.mxu1 %v2664_v61 }
 0x1be   :  { %1217 = vmatpush1.bf16.msra.mxu1 %v2665_v62 }
 0x1bf   :  { %1218 = vmatprep.subr.bf16.mxu1 %v2666_v0 }
 0x1c2   :  { %1219 = vmatpush1.bf16.msra.mxu1 %v2667_v2 }
 0x1c3   :  { %1220 = vmatprep.subr.bf16.mxu1 %v2668_v4 }
 0x1c6   :  { %1221 = vmatpush1.bf16.msra.mxu1 %v2669_v6 }
 0x1c7   :  { %1222 = vmatprep.subr.bf16.mxu1 %v2670_v58 }
 0x1ca   :  { %1223 = vmatpush1.bf16.msra.mxu1 %v2671_v9 }
 0x1cb   :  { %1224 = vmatprep.subr.bf16.mxu1 %v2672_v55 }
 0x1ce   :  { %1225 = vmatpush1.bf16.msra.mxu1 %v2673_v42 }
 0x224   :  { %v1030_v30 = vpop.f32.mrb[0].mxu1  ;;  %v1071_v50 = vpop.f32.mrb[8].mxu0 }
 0x225   :  { %v1031_v1 = vadd.f32 %v1030_v30, %v2512_v35  ;;  %v1032_v43 = vpop.f32.mrb[1].mxu1  ;;  %v1073_v10 = vpop.f32.mrb[9].mxu0  ;;  %v1072_v60 = vadd.f32 %v1071_v50, %v2522_v26  ;;  %v2679_v30 = vsub.s32 5, %v2674_v38 }
 0x226   :  { %v1033_v57 = vadd.f32 %v1032_v43, %v2516_v31  ;;  %v1034_v13 = vpop.f32.mrb[2].mxu1  ;;  %v1075_v15 = vpop.f32.mrb[10].mxu0  ;;  %v1074_v61 = vadd.f32 %v1073_v10, %v2526_v27 }
 0x227   :  { %v1612_v18 = vmul.f32 -1.442695, %v1031_v1  ;;  %v1035_v19 = vpop.f32.mrb[3].mxu1  ;;  %v1076_v21 = vpop.f32.mrb[11].mxu0  ;;  %v2536_v50 = vrot.slane %v484_v54, %v2679_v30 }
 0x228   :  { %v1613_v23 = vmul.f32 -1.442695, %v1033_v57 }
 0x229   :  { %1853 = vpow2.f32 %v1612_v18 }
 0x22a   :  { %1855 = vpow2.f32 %v1613_v23 }
 0x22b   :  { %1857 = vtanh.f32 %v1072_v60 }
 0x22c   :  { %1859 = vtanh.f32 %v1074_v61 }
 0x233   :  { %v1854_v62 = vpop.eup %1853 }
 0x234   :  { %v1856_v0 = vpop.eup %1855  ;;  %v1125_v2 = vadd.f32 1.0, %v1854_v62 }
 0x235   :  { %v1126_v4 = vadd.f32 1.0, %v1856_v0  ;;  %v1858_v6 = vpop.eup %1857 }
 0x236   :  { %1861 = vrcp.f32 %v1125_v2  ;;  %v1860_v58 = vpop.eup %1859 }
 0x237   :  { %1863 = vrcp.f32 %v1126_v4 }
 0x240   :  { %v1862_v9 = vpop.eup %1861 }
 0x241   :  { %v1864_v55 = vpop.eup %1863  ;;  %v1145_v42 = vmul.f32 %v1862_v9, %v1858_v6 }
 0x242   :  { %v1146_v34 = vmul.f32 %v1864_v55, %v1860_v58 }
 0x264   :  { %v1112_v1 = vpop.f32.mrb[4].mxu1 }
 0x265   :  { %v1113_v43 = vadd.f32 %v1112_v1, %v2532_v3  ;;  %v1114_v10 = vpop.f32.mrb[5].mxu1 }
 0x266   :  { %v1115_v57 = vadd.f32 %v1114_v10, %v2536_v50  ;;  %v1116_v13 = vpop.f32.mrb[6].mxu1 }
 0x267   :  { %v1614_v15 = vmul.f32 -1.442695, %v1113_v43  ;;  %v1117_v18 = vpop.f32.mrb[7].mxu1 }
 0x268   :  { %v1615_v19 = vmul.f32 -1.442695, %v1115_v57 }
 0x269   :  { %1865 = vpow2.f32 %v1614_v15 }
 0x26a   :  { %1867 = vpow2.f32 %v1615_v19 }
 0x26b   :  { %1869 = vtanh.f32 %v1145_v42 }
 0x26c   :  { %1871 = vtanh.f32 %v1146_v34 }
 0x273   :  { %v1866_v21 = vpop.eup %1865 }
 0x274   :  { %v1868_v23 = vpop.eup %1867  ;;  %v1139_v24 = vadd.f32 1.0, %v1866_v21 }
 0x275   :  { %v1140_v38 = vadd.f32 1.0, %v1868_v23  ;;  %v1870_v54 = vpop.eup %1869 }
 0x276   :  { %1873 = vrcp.f32 %v1139_v24  ;;  %v1872_v60 = vpop.eup %1871 }
 0x277   :  { %1875 = vrcp.f32 %v1140_v38 }
 0x280   :  { %v1874_v61 = vpop.eup %1873 }
 0x281   :  { %v1876_v62 = vpop.eup %1875  ;;  %v1149_v0 = vmul.f32 %v1874_v61, %v1870_v54 }
 0x282   :  { %v1150_v2 = vmul.f32 %v1876_v62, %v1872_v60 }
 0x283   :  { %v1151_v6 = vpack.c.bf16 %v1149_v0, %v1149_v0 }
 0x284   :  { %v1152_v4 = vpack.c.bf16 %v1150_v2, %v1150_v2  ;;  %v1620_v2 = vld [vmem:[%s2598_s6] ss:$0 sm:$0xff] }
 0x286   :  { %1185 = vmatprep.mubr.bf16.mxu0 %v1152_v4  ;;  %1226 = vmatprep.mubr.bf16.mxu1 %v1152_v4 }
 0x287   :  { %1186 = vmatmul.mubr.bf16.vlgmr.msra.gmra.mrb[12].mxu0 %v1151_v6  ;;  %1227 = vmatmul.mubr.bf16.vlgmr.msra.gmra.mrb[8].mxu1 %v1151_v6 }
 0x288   :  { %1236 = vmatpush1.bf16.msra.mxu0 %v2345_v51  ;;  %1267 = vmatprep.mubr.bf16.mxu0 %v1152_v4  ;;  %v1813_v51 = vld [vmem:[#allocation8 + $0x40] sm:$0xff]  }
 0x289   :  { %1237 = vmatprep.subr.bf16.mxu0 %v2349_v63  ;;  %v1814_v63 = vld [vmem:[#allocation8] sm:$0xff]   ;;  %1637 = vmatprep.subr.bf16.mxu1 %v1813_v51 }
 0x28a   :  { %1638 = vmatpush3.bf16.msra.mxu1 %v1814_v63 }
 0x28c   :  { %1238 = vmatpush1.bf16.msra.mxu0 %v2354_v7  ;;  %v1815_v7 = vld [vmem:[#allocation8 + $0x48] sm:$0xff]  }
 0x28d   :  { %1239 = vmatprep.subr.bf16.mxu0 %v2357_v47  ;;  %v1816_v47 = vld [vmem:[#allocation8 + $0x8] sm:$0xff]   ;;  %1639 = vmatprep.subr.bf16.mxu1 %v1815_v7 }
 0x28e   :  { %1640 = vmatpush3.bf16.msra.mxu1 %v1816_v47 }
 0x290   :  { %1240 = vmatpush1.bf16.msra.mxu0 %v2362_v46  ;;  %v1817_v46 = vld [vmem:[#allocation8 + $0x50] sm:$0xff]  }
 0x291   :  { %1241 = vmatprep.subr.bf16.mxu0 %v2365_v59  ;;  %v1818_v59 = vld [vmem:[#allocation8 + $0x10] sm:$0xff]   ;;  %1641 = vmatprep.subr.bf16.mxu1 %v1817_v46 }
 0x292   :  { %1642 = vmatpush3.bf16.msra.mxu1 %v1818_v59 }
 0x294   :  { %1242 = vmatpush1.bf16.msra.mxu0 %v2370_v5  ;;  %v1819_v5 = vld [vmem:[#allocation8 + $0x58] sm:$0xff]  }
 0x295   :  { %1243 = vmatprep.subr.bf16.mxu0 %v2373_v8  ;;  %v1820_v8 = vld [vmem:[#allocation8 + $0x18] sm:$0xff]   ;;  %1643 = vmatprep.subr.bf16.mxu1 %v1819_v5 }
 0x296   :  { %1644 = vmatpush3.bf16.msra.mxu1 %v1820_v8 }
 0x298   :  { %1244 = vmatpush1.bf16.msra.mxu0 %v2378_v11  ;;  %v1821_v11 = vld [vmem:[#allocation8 + $0x60] sm:$0xff]  }
 0x299   :  { %1245 = vmatprep.subr.bf16.mxu0 %v2381_v12  ;;  %v1822_v12 = vld [vmem:[#allocation8 + $0x20] sm:$0xff]   ;;  %1645 = vmatprep.subr.bf16.mxu1 %v1821_v11 }
 0x29a   :  { %1646 = vmatpush3.bf16.msra.mxu1 %v1822_v12 }
 0x29c   :  { %1246 = vmatpush1.bf16.msra.mxu0 %v2386_v14  ;;  %v1823_v14 = vld [vmem:[#allocation8 + $0x68] sm:$0xff]  }
 0x29d   :  { %1247 = vmatprep.subr.bf16.mxu0 %v2389_v16  ;;  %v1824_v16 = vld [vmem:[#allocation8 + $0x28] sm:$0xff]   ;;  %1647 = vmatprep.subr.bf16.mxu1 %v1823_v14 }
 0x29e   :  { %1648 = vmatpush3.bf16.msra.mxu1 %v1824_v16 }
 0x2a0   :  { %1248 = vmatpush1.bf16.msra.mxu0 %v2394_v17  ;;  %v1825_v17 = vld [vmem:[#allocation8 + $0x70] sm:$0xff]  }
 0x2a1   :  { %1249 = vmatprep.subr.bf16.mxu0 %v2397_v20  ;;  %v1826_v20 = vld [vmem:[#allocation8 + $0x30] sm:$0xff]   ;;  %1649 = vmatprep.subr.bf16.mxu1 %v1825_v17 }
 0x2a2   :  { %1650 = vmatpush3.bf16.msra.mxu1 %v1826_v20 }
 0x2a4   :  { %1250 = vmatpush1.bf16.msra.mxu0 %v2402_v22  ;;  %v1827_v22 = vld [vmem:[#allocation8 + $0x78] sm:$0xff]  }
 0x2a5   :  { %1251 = vmatprep.subr.bf16.mxu0 %v2405_v25  ;;  %v1828_v25 = vld [vmem:[#allocation8 + $0x38] sm:$0xff]   ;;  %1651 = vmatprep.subr.bf16.mxu1 %v1827_v22 }
 0x2a6   :  { %1652 = vmatpush3.bf16.msra.mxu1 %v1828_v25 }
 0x2a8   :  { %1252 = vmatpush1.bf16.msra.mxu0 %v2410_v28 }
 0x2a9   :  { %1253 = vmatprep.subr.bf16.mxu0 %v2413_v29 }
 0x2ac   :  { %1254 = vmatpush1.bf16.msra.mxu0 %v2418_v32 }
 0x2ad   :  { %1255 = vmatprep.subr.bf16.mxu0 %v2421_v33 }
 0x2b0   :  { %1256 = vmatpush1.bf16.msra.mxu0 %v2426_v36 }
 0x2b1   :  { %1257 = vmatprep.subr.bf16.mxu0 %v2429_v37 }
 0x2b4   :  { %1258 = vmatpush1.bf16.msra.mxu0 %v2434_v40 }
 0x2b5   :  { %1259 = vmatprep.subr.bf16.mxu0 %v2437_v41 }
 0x2b8   :  { %1260 = vmatpush1.bf16.msra.mxu0 %v2442_v44 }
 0x2b9   :  { %1261 = vmatprep.subr.bf16.mxu0 %v2445_v45 }
 0x2bc   :  { %1262 = vmatpush1.bf16.msra.mxu0 %v2450_v48 }
 0x2bd   :  { %1263 = vmatprep.subr.bf16.mxu0 %v2453_v49 }
 0x2c0   :  { %1264 = vmatpush1.bf16.msra.mxu0 %v2458_v52 }
 0x2c1   :  { %1265 = vmatprep.subr.bf16.mxu0 %v2461_v53 }
 0x2c4   :  { %1266 = vmatpush1.bf16.msra.mxu0 %v2466_v56 }
 0x2c7   :  { %1268 = vmatmul.mubr.bf16.vlgmr.msra.gmra.mrb[16].mxu0 %v1151_v6 }
 0x35a   :  { %v1187_v28 = vpop.f32.mrb[12].mxu0  ;;  %v1228_v29 = vpop.f32.mrb[8].mxu1 }
 0x35b   :  { %v1188_v32 = vadd.f32 %v1187_v28, %v2512_v35  ;;  %v1189_v33 = vpop.f32.mrb[13].mxu0  ;;  %v1230_v36 = vpop.f32.mrb[9].mxu1  ;;  %v1229_v52 = vadd.f32 %v1228_v29, %v2522_v26 }
 0x35c   :  { %v1190_v37 = vadd.f32 %v1189_v33, %v2516_v31  ;;  %v1191_v40 = vpop.f32.mrb[14].mxu0  ;;  %v1232_v41 = vpop.f32.mrb[10].mxu1  ;;  %v1231_v53 = vadd.f32 %v1230_v36, %v2526_v27 }
 0x35d   :  { %v1616_v44 = vmul.f32 -1.442695, %v1188_v32  ;;  %v1192_v45 = vpop.f32.mrb[15].mxu0  ;;  %v1233_v48 = vpop.f32.mrb[11].mxu1 }
 0x35e   :  { %v1617_v49 = vmul.f32 -1.442695, %v1190_v37 }
 0x35f   :  { %1877 = vpow2.f32 %v1616_v44 }
 0x360   :  { %1879 = vpow2.f32 %v1617_v49 }
 0x361   :  { %1881 = vtanh.f32 %v1229_v52 }
 0x362   :  { %1883 = vtanh.f32 %v1231_v53 }
 0x369   :  { %v1878_v56 = vpop.eup %1877 }
 0x36a   :  { %v1880_v58 = vpop.eup %1879  ;;  %v1282_v9 = vadd.f32 1.0, %v1878_v56 }
 0x36b   :  { %v1283_v35 = vadd.f32 1.0, %v1880_v58  ;;  %v1882_v31 = vpop.eup %1881 }
 0x36c   :  { %1885 = vrcp.f32 %v1282_v9  ;;  %v1884_v55 = vpop.eup %1883 }
 0x36d   :  { %1887 = vrcp.f32 %v1283_v35 }
 0x376   :  { %v1886_v42 = vpop.eup %1885 }
 0x377   :  { %v1888_v34 = vpop.eup %1887  ;;  %v1302_v39 = vmul.f32 %v1886_v42, %v1882_v31 }
 0x378   :  { %v1303_v30 = vmul.f32 %v1888_v34, %v1884_v55 }
 0x39a   :  { %v1269_v1 = vpop.f32.mrb[16].mxu0 }
 0x39b   :  { %v1270_v43 = vadd.f32 %v1269_v1, %v2532_v3  ;;  %v1271_v26 = vpop.f32.mrb[17].mxu0 }
 0x39c   :  { %v1272_v27 = vadd.f32 %v1271_v26, %v2536_v50  ;;  %v1273_v10 = vpop.f32.mrb[18].mxu0 }
 0x39d   :  { %v1618_v57 = vmul.f32 -1.442695, %v1270_v43  ;;  %v1274_v13 = vpop.f32.mrb[19].mxu0 }
 0x39e   :  { %v1619_v15 = vmul.f32 -1.442695, %v1272_v27 }
 0x39f   :  { %1889 = vpow2.f32 %v1618_v57 }
 0x3a0   :  { %1891 = vpow2.f32 %v1619_v15 }
 0x3a1   :  { %1893 = vtanh.f32 %v1302_v39 }
 0x3a2   :  { %1895 = vtanh.f32 %v1303_v30 }
 0x3a9   :  { %v1890_v18 = vpop.eup %1889 }
 0x3aa   :  { %v1892_v19 = vpop.eup %1891  ;;  %v1296_v21 = vadd.f32 1.0, %v1890_v18 }
 0x3ab   :  { %v1297_v23 = vadd.f32 1.0, %v1892_v19  ;;  %v1894_v24 = vpop.eup %1893 }
 0x3ac   :  { %1897 = vrcp.f32 %v1296_v21  ;;  %v1896_v38 = vpop.eup %1895 }
 0x3ad   :  { %1899 = vrcp.f32 %v1297_v23 }
 0x3b6   :  { %v1898_v3 = vpop.eup %1897 }
 0x3b7   :  { %v1900_v54 = vpop.eup %1899  ;;  %v1306_v60 = vmul.f32 %v1898_v3, %v1894_v24 }
 0x3b8   :  { %v1307_v50 = vmul.f32 %v1900_v54, %v1896_v38 }
 0x3b9   :  { %v1308_v62 = vpack.c.bf16 %v1306_v60, %v1306_v60 }
 0x3ba   :  { %v1309_v61 = vpack.c.bf16 %v1307_v50, %v1307_v50 }
 0x3bc   :  { %1477 = vmatprep.mubr.bf16.mxu1 %v1309_v61 }
 0x3bd   :  { %1478 = vmatmul.mubr.bf16.vlgmr.msra.gmra.mrb[12].mxu1 %v1308_v62 }
 0x490   :  { %v1653_v0 = vpop.f32.mrb[12].mxu1 }
 0x491   :  { %v1654_v4 = vpop.f32.mrb[13].mxu1 }
 0x492   :  { %v1655_v6 = vadd.f32 %v1654_v4, %v1653_v0  ;;  %v1656_v51 = vpop.f32.mrb[14].mxu1 }
 0x493   :  { %v1657_v63 = vpop.f32.mrb[15].mxu1 }
 0x494   :  { %v1480_v7 = vadd.f32 %v1655_v6, %v1620_v2 }
 0x496   :  { %1485 = vst [vmem:[#allocation10] sm:$0x3] %v1480_v7 }
 0x497   :  { %2000 = shalt.err (!%p1997_p8)
}
 0x498   :  { %s2001_s6 = scalar_lea.hbm %s2599_s7, 32 }
 0x499   :  { %p2002_p9 = scmp.ne.s32.totalorder %s2599_s7, %s2001_s6  ;;  %p2005_p10 = scmp.lt.u32.totalorder %s2001_s6, %s2599_s7 }
 0x49b   :  { %p2007_p11 = pnand %p2005_p10, %p2002_p9 }
 0x49d   :  { %2010 = shalt.err (!%p2007_p11)
}
 0x49e   :  { %1495 = dma.vmem_to_hbm [thread:$0]  %s1493_s8, 32, %s2599_s7, [#allocation4]  }
 0x49f   :  { %2017 = dma.done.wait [#allocation4], 32  }
 0x4a0   :  { %2018 = vsyncadd [#allocation4], 4294967264 }
 0x4a1   :  { %1499 = vsyncpa [#allocation3], 1 }
 0x4a2   :  { %1500 = vsyncpa [#allocation6], 1 }
 0x4a3   :  { %1501 = vsyncpa [#allocation9], 1 }
 0x4a4   :  { %1502 = vsyncpa [#allocation4], 1 }

</bundles_post_ra>
